<compile_context>
chip_gen: v7x
topology: tpu7x:2x2x1
jax: 0.10.0
libtpu: 0.0.40
codegen_flags: <defaults>
</compile_context>

<pallas_src>
import functools

import jax
import jax.numpy as jnp
from jax.experimental import pallas as pl
from jax.experimental.pallas import tpu as pltpu


def _round_up(x, m):
    return (x + m - 1) // m * m


def _pdice_kernel(x_ref, tgt_ref, w_ref, loss_ref, acc_num, acc_den,
                  *, n_classes, ignore_index):
    """One flattened-HW tile per grid step.

    x_ref   : (B, C, T)       scores in their original dtype (VMEM)
    tgt_ref : (B, T) int32    labels (VMEM)
    w_ref   : (n_classes,)    class weights (SMEM)
    loss_ref: (1, 1) f32      output, written on the last grid step
    acc_num : (n_classes, T) f32 scratch -- per-class intersect lane partials
    acc_den : (n_classes, T) f32 scratch -- per-class (y_sum + z_sum) partials
    """
    step = pl.program_id(0)

    @pl.when(step == 0)
    def _init():
        acc_num[...] = jnp.zeros_like(acc_num)
        acc_den[...] = jnp.zeros_like(acc_den)

    tgt = tgt_ref[...]                                      # (B, T) int32
    mask = (tgt != ignore_index).astype(jnp.float32)        # (B, T)
    # sum_b m[b, hw]  (the factorized broadcast term)
    msum = jnp.sum(mask, axis=0, keepdims=True)             # (1, T)

    for i in range(n_classes):                              # static, small C
        row = pl.ds(i, 1)
        s = x_ref[:, i, :].astype(jnp.float32)              # (B, T)
        t = (tgt == i).astype(jnp.float32)                  # one-hot channel i
        st = jnp.sum(s * t, axis=0, keepdims=True)          # (1, T) sum_b s*t
        sd = jnp.sum(s * s + t, axis=0, keepdims=True)      # (1, T) sum_b(s*s + t)  (t*t == t)
        acc_num[row, :] = acc_num[row, :] + st * msum
        acc_den[row, :] = acc_den[row, :] + sd * msum

    @pl.when(step == pl.num_programs(0) - 1)
    def _finalize():
        smooth = 1e-5
        loss = jnp.zeros((1, 1), jnp.float32)
        wsum = jnp.zeros((1, 1), jnp.float32)
        for i in range(n_classes):
            row = pl.ds(i, 1)
            inter = jnp.sum(acc_num[row, :], axis=1, keepdims=True)   # (1, 1)
            denom = jnp.sum(acc_den[row, :], axis=1, keepdims=True)   # (1, 1)
            dice = 1.0 - (2.0 * inter + smooth) / (denom + smooth)
            w_i = w_ref[i]
            loss = loss + dice * w_i
            wsum = wsum + w_i
        loss_ref[...] = loss / wsum


def p_dice_loss(inputs, target, weight=None, *, n_classes, ignore_index,
                block_hw=2048):
    """JAX/Pallas equivalent of pDLoss.forward (pDLoss has no parameters)."""
    if target.ndim == 3:
        target = target[:, None, :, :]
    B, C, H, W = inputs.shape
    # pDLoss only ever uses the (single) first target channel.
    tgt = target[:, 0, :, :]

    HW = H * W
    # Lane-dense: flatten H*W onto the lane axis; keep original score dtype.
    x = inputs.reshape(B, C, HW)
    tgt = tgt.reshape(B, HW).astype(jnp.int32)   # integer labels on the wire

    blk = min(block_hw, _round_up(HW, 128))
    hw_pad = _round_up(HW, blk)
    if hw_pad != HW:
        # Padded labels = ignore_index -> mask-sum 0 -> zero contribution (exact).
        x = jnp.pad(x, ((0, 0), (0, 0), (0, hw_pad - HW)))
        tgt = jnp.pad(tgt, ((0, 0), (0, hw_pad - HW)),
                      constant_values=int(ignore_index))

    if weight is None:
        weight = jnp.ones((n_classes,), jnp.float32)
    else:
        weight = jnp.asarray(weight, jnp.float32)

    kernel = functools.partial(_pdice_kernel, n_classes=n_classes,
                               ignore_index=int(ignore_index))

    grid = (hw_pad // blk,)
    out = pl.pallas_call(
        kernel,
        out_shape=jax.ShapeDtypeStruct((1, 1), jnp.float32),
        grid_spec=pltpu.PrefetchScalarGridSpec(
            num_scalar_prefetch=0,
            grid=grid,
            in_specs=[
                pl.BlockSpec((B, C, blk), lambda t: (0, 0, t)),   # scores
                pl.BlockSpec((B, blk), lambda t: (0, t)),         # int32 labels
                pl.BlockSpec(memory_space=pltpu.MemorySpace.SMEM),  # class weights
            ],
            out_specs=pl.BlockSpec((1, 1), lambda t: (0, 0)),
            scratch_shapes=[
                pltpu.VMEM((n_classes, blk), jnp.float32),   # intersect partials
                pltpu.VMEM((n_classes, blk), jnp.float32),   # denom partials
            ]),
        compiler_params=pltpu.CompilerParams(
            dimension_semantics=("arbitrary",)),
    )(x, tgt, weight)
    return out[0, 0]


def ref_pdloss(inputs, target, n_classes, ignore_index, weight=None):
    """Pure-JAX reference mirroring the PyTorch code literally
    (including the (B,H,W)*(B,1,H,W) -> (B,B,H,W) broadcast)."""
    if target.ndim == 3:
        target = target[:, None, :, :]
    B, C, H, W = inputs.shape
    target = target[:, :C, :, :]
    ignore_mask = jnp.where(target == ignore_index, 0.0, 1.0)     # (B,1,H,W)
    one_hot = jnp.concatenate(
        [(target == i).astype(jnp.float32) for i in range(n_classes)], axis=1)
    if weight is None:
        weight = jnp.ones((n_classes,), jnp.float32)
    smooth = 1e-5
    loss = 0.0
    for i in range(n_classes):
        s = inputs[:, i]          # (B,H,W)
        t = one_hot[:, i]         # (B,H,W)
        intersect = jnp.sum(s * t * ignore_mask)     # broadcasts to (B,B,H,W)
        y_sum = jnp.sum(t * t * ignore_mask)
        z_sum = jnp.sum(s * s * ignore_mask)
        dice = 1.0 - (2.0 * intersect + smooth) / (z_sum + y_sum + smooth)
        loss = loss + dice * weight[i]
    return loss / jnp.sum(weight)


if __name__ == "__main__":
    key = jax.random.PRNGKey(0)
    n_classes, ignore_index = 4, -1
    B, C, H, W = 2, 4, 16, 16

    k1, k2, k3 = jax.random.split(key, 3)
    logits = jax.random.normal(k1, (B, C, H, W), jnp.float32)
    probs = jax.nn.softmax(logits, axis=1)                       # scores
    labels = jax.random.randint(k2, (B, 1, H, W), 0, n_classes)
    ign = jax.random.bernoulli(k3, 0.1, (B, 1, H, W))
    target = jnp.where(ign, ignore_index, labels).astype(jnp.float32)

    loss = p_dice_loss(probs, target, n_classes=n_classes,
                       ignore_index=ignore_index)
    loss = jax.block_until_ready(loss)

    ref = ref_pdloss(probs, target, n_classes, ignore_index)
    assert jnp.allclose(loss, ref, atol=1e-5, rtol=1e-5), (loss, ref)
    print("KERNEL_OK")
</pallas_src>

<mosaic_0001>
module attributes {stable_mosaic.version = 11 : i64} {
  func.func @_pdice_kernel(%arg0: i32, %arg1: memref<2x4x256xf32, #tpu.memory_space<vmem>>, %arg2: memref<2x256xi32, #tpu.memory_space<vmem>>, %arg3: memref<4xf32, #tpu.memory_space<smem>>, %arg4: memref<1x1xf32, #tpu.memory_space<vmem>>, %arg5: memref<4x256xf32, #tpu.memory_space<vmem>>, %arg6: memref<4x256xf32, #tpu.memory_space<vmem>>) attributes {dimension_semantics = [#tpu.dimension_semantics<arbitrary>], iteration_bounds = array<i64: 1>, scalar_prefetch = 0 : i64, scratch_operands = 2 : i64, tpu.core_type = #tpu.core_type<tc>, window_params = [{transform_indices = @transform_0, window_bounds = array<i64: 2, 4, 256>}, {transform_indices = @transform_1, window_bounds = array<i64: 2, 256>}, {transform_indices = @transform_2, window_bounds = array<i64: 4>}, {pipeline_mode = #tpu.pipeline_mode<synchronous>, transform_indices = @transform_3, window_bounds = array<i64: 1, 1>}]} {
    %c0_i32 = arith.constant 0 : i32
    %0 = arith.cmpi eq, %arg0, %c0_i32 : i32
    %1 = arith.extui %0 : i1 to i32
    %c0_i32_0 = arith.constant 0 : i32
    %2 = arith.cmpi ne, %1, %c0_i32_0 : i32
    scf.if %2 {
      %cst_54 = arith.constant 0.000000e+00 : f32
      %97 = vector.broadcast %cst_54 : f32 to vector<4x256xf32>
      %c0_55 = arith.constant 0 : index
      %c0_56 = arith.constant 0 : index
      %98 = vector.load %arg5[%c0_55, %c0_56] : memref<4x256xf32, #tpu.memory_space<vmem>>, vector<4x256xf32>
      tpu.vector_store %arg5[%c0_55, %c0_56], %97 {strides = array<i32>} : memref<4x256xf32, #tpu.memory_space<vmem>>, vector<4x256xf32>,
      %cst_57 = arith.constant 0.000000e+00 : f32
      %99 = vector.broadcast %cst_57 : f32 to vector<4x256xf32>
      %c0_58 = arith.constant 0 : index
      %c0_59 = arith.constant 0 : index
      %100 = vector.load %arg6[%c0_58, %c0_59] : memref<4x256xf32, #tpu.memory_space<vmem>>, vector<4x256xf32>
      tpu.vector_store %arg6[%c0_58, %c0_59], %99 {strides = array<i32>} : memref<4x256xf32, #tpu.memory_space<vmem>>, vector<4x256xf32>,
    } else {
    }
    %c0 = arith.constant 0 : index
    %c0_1 = arith.constant 0 : index
    %3 = vector.load %arg2[%c0, %c0_1] : memref<2x256xi32, #tpu.memory_space<vmem>>, vector<2x256xi32>
    %c-1_i32 = arith.constant -1 : i32
    %4 = vector.broadcast %c-1_i32 : i32 to vector<2x256xi32>
    %5 = arith.cmpi ne, %3, %4 : vector<2x256xi32>
    %6 = arith.extui %5 : vector<2x256xi1> to vector<2x256xi32>
    %7 = arith.sitofp %6 : vector<2x256xi32> to vector<2x256xf32>
    %cst = arith.constant dense<0.000000e+00> : vector<256xf32>
    %8 = vector.multi_reduction <add>, %7, %cst [0] : vector<2x256xf32> to vector<256xf32>
    %9 = vector.shape_cast %8 : vector<256xf32> to vector<1x256xf32>
    %c0_2 = arith.constant 0 : index
    %c0_3 = arith.constant 0 : index
    %c0_4 = arith.constant 0 : index
    %10 = vector.load %arg1[%c0_2, %c0_3, %c0_4] : memref<2x4x256xf32, #tpu.memory_space<vmem>>, vector<2x1x256xf32>
    %11 = vector.shape_cast %10 : vector<2x1x256xf32> to vector<2x256xf32>
    %c0_i32_5 = arith.constant 0 : i32
    %12 = vector.broadcast %c0_i32_5 : i32 to vector<2x256xi32>
    %13 = arith.cmpi eq, %3, %12 : vector<2x256xi32>
    %14 = arith.extui %13 : vector<2x256xi1> to vector<2x256xi32>
    %15 = arith.sitofp %14 : vector<2x256xi32> to vector<2x256xf32>
    %16 = arith.mulf %11, %15 : vector<2x256xf32>
    %cst_6 = arith.constant dense<0.000000e+00> : vector<256xf32>
    %17 = vector.multi_reduction <add>, %16, %cst_6 [0] : vector<2x256xf32> to vector<256xf32>
    %18 = vector.shape_cast %17 : vector<256xf32> to vector<1x256xf32>
    %19 = arith.mulf %11, %11 : vector<2x256xf32>
    %20 = arith.addf %19, %15 : vector<2x256xf32>
    %cst_7 = arith.constant dense<0.000000e+00> : vector<256xf32>
    %21 = vector.multi_reduction <add>, %20, %cst_7 [0] : vector<2x256xf32> to vector<256xf32>
    %22 = vector.shape_cast %21 : vector<256xf32> to vector<1x256xf32>
    %c0_8 = arith.constant 0 : index
    %c0_9 = arith.constant 0 : index
    %23 = vector.load %arg5[%c0_8, %c0_9] : memref<4x256xf32, #tpu.memory_space<vmem>>, vector<1x256xf32>
    %24 = arith.mulf %18, %9 : vector<1x256xf32>
    %25 = arith.addf %23, %24 : vector<1x256xf32>
    %c0_10 = arith.constant 0 : index
    %c0_11 = arith.constant 0 : index
    %26 = vector.load %arg5[%c0_10, %c0_11] : memref<4x256xf32, #tpu.memory_space<vmem>>, vector<1x256xf32>
    tpu.vector_store %arg5[%c0_10, %c0_11], %25 {strides = array<i32>} : memref<4x256xf32, #tpu.memory_space<vmem>>, vector<1x256xf32>,
    %c0_12 = arith.constant 0 : index
    %c0_13 = arith.constant 0 : index
    %27 = vector.load %arg6[%c0_12, %c0_13] : memref<4x256xf32, #tpu.memory_space<vmem>>, vector<1x256xf32>
    %28 = arith.mulf %22, %9 : vector<1x256xf32>
    %29 = arith.addf %27, %28 : vector<1x256xf32>
    %c0_14 = arith.constant 0 : index
    %c0_15 = arith.constant 0 : index
    %30 = vector.load %arg6[%c0_14, %c0_15] : memref<4x256xf32, #tpu.memory_space<vmem>>, vector<1x256xf32>
    tpu.vector_store %arg6[%c0_14, %c0_15], %29 {strides = array<i32>} : memref<4x256xf32, #tpu.memory_space<vmem>>, vector<1x256xf32>,
    %c0_16 = arith.constant 0 : index
    %c1 = arith.constant 1 : index
    %c0_17 = arith.constant 0 : index
    %31 = vector.load %arg1[%c0_16, %c1, %c0_17] : memref<2x4x256xf32, #tpu.memory_space<vmem>>, vector<2x1x256xf32>
    %32 = vector.shape_cast %31 : vector<2x1x256xf32> to vector<2x256xf32>
    %c1_i32 = arith.constant 1 : i32
    %33 = vector.broadcast %c1_i32 : i32 to vector<2x256xi32>
    %34 = arith.cmpi eq, %3, %33 : vector<2x256xi32>
    %35 = arith.extui %34 : vector<2x256xi1> to vector<2x256xi32>
    %36 = arith.sitofp %35 : vector<2x256xi32> to vector<2x256xf32>
    %37 = arith.mulf %32, %36 : vector<2x256xf32>
    %cst_18 = arith.constant dense<0.000000e+00> : vector<256xf32>
    %38 = vector.multi_reduction <add>, %37, %cst_18 [0] : vector<2x256xf32> to vector<256xf32>
    %39 = vector.shape_cast %38 : vector<256xf32> to vector<1x256xf32>
    %40 = arith.mulf %32, %32 : vector<2x256xf32>
    %41 = arith.addf %40, %36 : vector<2x256xf32>
    %cst_19 = arith.constant dense<0.000000e+00> : vector<256xf32>
    %42 = vector.multi_reduction <add>, %41, %cst_19 [0] : vector<2x256xf32> to vector<256xf32>
    %43 = vector.shape_cast %42 : vector<256xf32> to vector<1x256xf32>
    %c1_20 = arith.constant 1 : index
    %c0_21 = arith.constant 0 : index
    %44 = vector.load %arg5[%c1_20, %c0_21] : memref<4x256xf32, #tpu.memory_space<vmem>>, vector<1x256xf32>
    %45 = arith.mulf %39, %9 : vector<1x256xf32>
    %46 = arith.addf %44, %45 : vector<1x256xf32>
    %c1_22 = arith.constant 1 : index
    %c0_23 = arith.constant 0 : index
    %47 = vector.load %arg5[%c1_22, %c0_23] : memref<4x256xf32, #tpu.memory_space<vmem>>, vector<1x256xf32>
    tpu.vector_store %arg5[%c1_22, %c0_23], %46 {strides = array<i32>} : memref<4x256xf32, #tpu.memory_space<vmem>>, vector<1x256xf32>,
    %c1_24 = arith.constant 1 : index
    %c0_25 = arith.constant 0 : index
    %48 = vector.load %arg6[%c1_24, %c0_25] : memref<4x256xf32, #tpu.memory_space<vmem>>, vector<1x256xf32>
    %49 = arith.mulf %43, %9 : vector<1x256xf32>
    %50 = arith.addf %48, %49 : vector<1x256xf32>
    %c1_26 = arith.constant 1 : index
    %c0_27 = arith.constant 0 : index
    %51 = vector.load %arg6[%c1_26, %c0_27] : memref<4x256xf32, #tpu.memory_space<vmem>>, vector<1x256xf32>
    tpu.vector_store %arg6[%c1_26, %c0_27], %50 {strides = array<i32>} : memref<4x256xf32, #tpu.memory_space<vmem>>, vector<1x256xf32>,
    %c0_28 = arith.constant 0 : index
    %c2 = arith.constant 2 : index
    %c0_29 = arith.constant 0 : index
    %52 = vector.load %arg1[%c0_28, %c2, %c0_29] : memref<2x4x256xf32, #tpu.memory_space<vmem>>, vector<2x1x256xf32>
    %53 = vector.shape_cast %52 : vector<2x1x256xf32> to vector<2x256xf32>
    %c2_i32 = arith.constant 2 : i32
    %54 = vector.broadcast %c2_i32 : i32 to vector<2x256xi32>
    %55 = arith.cmpi eq, %3, %54 : vector<2x256xi32>
    %56 = arith.extui %55 : vector<2x256xi1> to vector<2x256xi32>
    %57 = arith.sitofp %56 : vector<2x256xi32> to vector<2x256xf32>
    %58 = arith.mulf %53, %57 : vector<2x256xf32>
    %cst_30 = arith.constant dense<0.000000e+00> : vector<256xf32>
    %59 = vector.multi_reduction <add>, %58, %cst_30 [0] : vector<2x256xf32> to vector<256xf32>
    %60 = vector.shape_cast %59 : vector<256xf32> to vector<1x256xf32>
    %61 = arith.mulf %53, %53 : vector<2x256xf32>
    %62 = arith.addf %61, %57 : vector<2x256xf32>
    %cst_31 = arith.constant dense<0.000000e+00> : vector<256xf32>
    %63 = vector.multi_reduction <add>, %62, %cst_31 [0] : vector<2x256xf32> to vector<256xf32>
    %64 = vector.shape_cast %63 : vector<256xf32> to vector<1x256xf32>
    %c2_32 = arith.constant 2 : index
    %c0_33 = arith.constant 0 : index
    %65 = vector.load %arg5[%c2_32, %c0_33] : memref<4x256xf32, #tpu.memory_space<vmem>>, vector<1x256xf32>
    %66 = arith.mulf %60, %9 : vector<1x256xf32>
    %67 = arith.addf %65, %66 : vector<1x256xf32>
    %c2_34 = arith.constant 2 : index
    %c0_35 = arith.constant 0 : index
    %68 = vector.load %arg5[%c2_34, %c0_35] : memref<4x256xf32, #tpu.memory_space<vmem>>, vector<1x256xf32>
    tpu.vector_store %arg5[%c2_34, %c0_35], %67 {strides = array<i32>} : memref<4x256xf32, #tpu.memory_space<vmem>>, vector<1x256xf32>,
    %c2_36 = arith.constant 2 : index
    %c0_37 = arith.constant 0 : index
    %69 = vector.load %arg6[%c2_36, %c0_37] : memref<4x256xf32, #tpu.memory_space<vmem>>, vector<1x256xf32>
    %70 = arith.mulf %64, %9 : vector<1x256xf32>
    %71 = arith.addf %69, %70 : vector<1x256xf32>
    %c2_38 = arith.constant 2 : index
    %c0_39 = arith.constant 0 : index
    %72 = vector.load %arg6[%c2_38, %c0_39] : memref<4x256xf32, #tpu.memory_space<vmem>>, vector<1x256xf32>
    tpu.vector_store %arg6[%c2_38, %c0_39], %71 {strides = array<i32>} : memref<4x256xf32, #tpu.memory_space<vmem>>, vector<1x256xf32>,
    %c0_40 = arith.constant 0 : index
    %c3 = arith.constant 3 : index
    %c0_41 = arith.constant 0 : index
    %73 = vector.load %arg1[%c0_40, %c3, %c0_41] : memref<2x4x256xf32, #tpu.memory_space<vmem>>, vector<2x1x256xf32>
    %74 = vector.shape_cast %73 : vector<2x1x256xf32> to vector<2x256xf32>
    %c3_i32 = arith.constant 3 : i32
    %75 = vector.broadcast %c3_i32 : i32 to vector<2x256xi32>
    %76 = arith.cmpi eq, %3, %75 : vector<2x256xi32>
    %77 = arith.extui %76 : vector<2x256xi1> to vector<2x256xi32>
    %78 = arith.sitofp %77 : vector<2x256xi32> to vector<2x256xf32>
    %79 = arith.mulf %74, %78 : vector<2x256xf32>
    %cst_42 = arith.constant dense<0.000000e+00> : vector<256xf32>
    %80 = vector.multi_reduction <add>, %79, %cst_42 [0] : vector<2x256xf32> to vector<256xf32>
    %81 = vector.shape_cast %80 : vector<256xf32> to vector<1x256xf32>
    %82 = arith.mulf %74, %74 : vector<2x256xf32>
    %83 = arith.addf %82, %78 : vector<2x256xf32>
    %cst_43 = arith.constant dense<0.000000e+00> : vector<256xf32>
    %84 = vector.multi_reduction <add>, %83, %cst_43 [0] : vector<2x256xf32> to vector<256xf32>
    %85 = vector.shape_cast %84 : vector<256xf32> to vector<1x256xf32>
    %c3_44 = arith.constant 3 : index
    %c0_45 = arith.constant 0 : index
    %86 = vector.load %arg5[%c3_44, %c0_45] : memref<4x256xf32, #tpu.memory_space<vmem>>, vector<1x256xf32>
    %87 = arith.mulf %81, %9 : vector<1x256xf32>
    %88 = arith.addf %86, %87 : vector<1x256xf32>
    %c3_46 = arith.constant 3 : index
    %c0_47 = arith.constant 0 : index
    %89 = vector.load %arg5[%c3_46, %c0_47] : memref<4x256xf32, #tpu.memory_space<vmem>>, vector<1x256xf32>
    tpu.vector_store %arg5[%c3_46, %c0_47], %88 {strides = array<i32>} : memref<4x256xf32, #tpu.memory_space<vmem>>, vector<1x256xf32>,
    %c3_48 = arith.constant 3 : index
    %c0_49 = arith.constant 0 : index
    %90 = vector.load %arg6[%c3_48, %c0_49] : memref<4x256xf32, #tpu.memory_space<vmem>>, vector<1x256xf32>
    %91 = arith.mulf %85, %9 : vector<1x256xf32>
    %92 = arith.addf %90, %91 : vector<1x256xf32>
    %c3_50 = arith.constant 3 : index
    %c0_51 = arith.constant 0 : index
    %93 = vector.load %arg6[%c3_50, %c0_51] : memref<4x256xf32, #tpu.memory_space<vmem>>, vector<1x256xf32>
    tpu.vector_store %arg6[%c3_50, %c0_51], %92 {strides = array<i32>} : memref<4x256xf32, #tpu.memory_space<vmem>>, vector<1x256xf32>,
    %c0_i32_52 = arith.constant 0 : i32
    %94 = arith.cmpi eq, %arg0, %c0_i32_52 : i32
    %95 = arith.extui %94 : i1 to i32
    %c0_i32_53 = arith.constant 0 : i32
    %96 = arith.cmpi ne, %95, %c0_i32_53 : i32
    scf.if %96 {
      %cst_54 = arith.constant 0.000000e+00 : f32
      %97 = vector.broadcast %cst_54 : f32 to vector<1x1xf32>
      %cst_55 = arith.constant 0.000000e+00 : f32
      %98 = vector.broadcast %cst_55 : f32 to vector<1x1xf32>
      %c0_56 = arith.constant 0 : index
      %c0_57 = arith.constant 0 : index
      %99 = vector.load %arg5[%c0_56, %c0_57] : memref<4x256xf32, #tpu.memory_space<vmem>>, vector<1x256xf32>
      %cst_58 = arith.constant dense<0.000000e+00> : vector<1xf32>
      %100 = vector.multi_reduction <add>, %99, %cst_58 [1] : vector<1x256xf32> to vector<1xf32>
      %101 = vector.shape_cast %100 : vector<1xf32> to vector<1x1xf32>
      %c0_59 = arith.constant 0 : index
      %c0_60 = arith.constant 0 : index
      %102 = vector.load %arg6[%c0_59, %c0_60] : memref<4x256xf32, #tpu.memory_space<vmem>>, vector<1x256xf32>
      %cst_61 = arith.constant dense<0.000000e+00> : vector<1xf32>
      %103 = vector.multi_reduction <add>, %102, %cst_61 [1] : vector<1x256xf32> to vector<1xf32>
      %104 = vector.shape_cast %103 : vector<1xf32> to vector<1x1xf32>
      %cst_62 = arith.constant 2.000000e+00 : f32
      %105 = vector.broadcast %cst_62 : f32 to vector<1x1xf32>
      %106 = arith.mulf %105, %101 : vector<1x1xf32>
      %cst_63 = arith.constant 9.99999974E-6 : f32
      %107 = vector.broadcast %cst_63 : f32 to vector<1x1xf32>
      %108 = arith.addf %106, %107 : vector<1x1xf32>
      %cst_64 = arith.constant 9.99999974E-6 : f32
      %109 = vector.broadcast %cst_64 : f32 to vector<1x1xf32>
      %110 = arith.addf %104, %109 : vector<1x1xf32>
      %111 = arith.divf %108, %110 : vector<1x1xf32>
      %cst_65 = arith.constant 1.000000e+00 : f32
      %112 = vector.broadcast %cst_65 : f32 to vector<1x1xf32>
      %113 = arith.subf %112, %111 : vector<1x1xf32>
      %c0_66 = arith.constant 0 : index
      %114 = memref.load %arg3[%c0_66] : memref<4xf32, #tpu.memory_space<smem>>
      %115 = vector.broadcast %114 : f32 to vector<1x1xf32>
      %116 = arith.mulf %113, %115 : vector<1x1xf32>
      %117 = arith.addf %97, %116 : vector<1x1xf32>
      %118 = vector.broadcast %114 : f32 to vector<1x1xf32>
      %119 = arith.addf %98, %118 : vector<1x1xf32>
      %c1_67 = arith.constant 1 : index
      %c0_68 = arith.constant 0 : index
      %120 = vector.load %arg5[%c1_67, %c0_68] : memref<4x256xf32, #tpu.memory_space<vmem>>, vector<1x256xf32>
      %cst_69 = arith.constant dense<0.000000e+00> : vector<1xf32>
      %121 = vector.multi_reduction <add>, %120, %cst_69 [1] : vector<1x256xf32> to vector<1xf32>
      %122 = vector.shape_cast %121 : vector<1xf32> to vector<1x1xf32>
      %c1_70 = arith.constant 1 : index
      %c0_71 = arith.constant 0 : index
      %123 = vector.load %arg6[%c1_70, %c0_71] : memref<4x256xf32, #tpu.memory_space<vmem>>, vector<1x256xf32>
      %cst_72 = arith.constant dense<0.000000e+00> : vector<1xf32>
      %124 = vector.multi_reduction <add>, %123, %cst_72 [1] : vector<1x256xf32> to vector<1xf32>
      %125 = vector.shape_cast %124 : vector<1xf32> to vector<1x1xf32>
      %cst_73 = arith.constant 2.000000e+00 : f32
      %126 = vector.broadcast %cst_73 : f32 to vector<1x1xf32>
      %127 = arith.mulf %126, %122 : vector<1x1xf32>
      %cst_74 = arith.constant 9.99999974E-6 : f32
      %128 = vector.broadcast %cst_74 : f32 to vector<1x1xf32>
      %129 = arith.addf %127, %128 : vector<1x1xf32>
      %cst_75 = arith.constant 9.99999974E-6 : f32
      %130 = vector.broadcast %cst_75 : f32 to vector<1x1xf32>
      %131 = arith.addf %125, %130 : vector<1x1xf32>
      %132 = arith.divf %129, %131 : vector<1x1xf32>
      %cst_76 = arith.constant 1.000000e+00 : f32
      %133 = vector.broadcast %cst_76 : f32 to vector<1x1xf32>
      %134 = arith.subf %133, %132 : vector<1x1xf32>
      %c1_77 = arith.constant 1 : index
      %135 = memref.load %arg3[%c1_77] : memref<4xf32, #tpu.memory_space<smem>>
      %136 = vector.broadcast %135 : f32 to vector<1x1xf32>
      %137 = arith.mulf %134, %136 : vector<1x1xf32>
      %138 = arith.addf %117, %137 : vector<1x1xf32>
      %139 = vector.broadcast %135 : f32 to vector<1x1xf32>
      %140 = arith.addf %119, %139 : vector<1x1xf32>
      %c2_78 = arith.constant 2 : index
      %c0_79 = arith.constant 0 : index
      %141 = vector.load %arg5[%c2_78, %c0_79] : memref<4x256xf32, #tpu.memory_space<vmem>>, vector<1x256xf32>
      %cst_80 = arith.constant dense<0.000000e+00> : vector<1xf32>
      %142 = vector.multi_reduction <add>, %141, %cst_80 [1] : vector<1x256xf32> to vector<1xf32>
      %143 = vector.shape_cast %142 : vector<1xf32> to vector<1x1xf32>
      %c2_81 = arith.constant 2 : index
      %c0_82 = arith.constant 0 : index
      %144 = vector.load %arg6[%c2_81, %c0_82] : memref<4x256xf32, #tpu.memory_space<vmem>>, vector<1x256xf32>
      %cst_83 = arith.constant dense<0.000000e+00> : vector<1xf32>
      %145 = vector.multi_reduction <add>, %144, %cst_83 [1] : vector<1x256xf32> to vector<1xf32>
      %146 = vector.shape_cast %145 : vector<1xf32> to vector<1x1xf32>
      %cst_84 = arith.constant 2.000000e+00 : f32
      %147 = vector.broadcast %cst_84 : f32 to vector<1x1xf32>
      %148 = arith.mulf %147, %143 : vector<1x1xf32>
      %cst_85 = arith.constant 9.99999974E-6 : f32
      %149 = vector.broadcast %cst_85 : f32 to vector<1x1xf32>
      %150 = arith.addf %148, %149 : vector<1x1xf32>
      %cst_86 = arith.constant 9.99999974E-6 : f32
      %151 = vector.broadcast %cst_86 : f32 to vector<1x1xf32>
      %152 = arith.addf %146, %151 : vector<1x1xf32>
      %153 = arith.divf %150, %152 : vector<1x1xf32>
      %cst_87 = arith.constant 1.000000e+00 : f32
      %154 = vector.broadcast %cst_87 : f32 to vector<1x1xf32>
      %155 = arith.subf %154, %153 : vector<1x1xf32>
      %c2_88 = arith.constant 2 : index
      %156 = memref.load %arg3[%c2_88] : memref<4xf32, #tpu.memory_space<smem>>
      %157 = vector.broadcast %156 : f32 to vector<1x1xf32>
      %158 = arith.mulf %155, %157 : vector<1x1xf32>
      %159 = arith.addf %138, %158 : vector<1x1xf32>
      %160 = vector.broadcast %156 : f32 to vector<1x1xf32>
      %161 = arith.addf %140, %160 : vector<1x1xf32>
      %c3_89 = arith.constant 3 : index
      %c0_90 = arith.constant 0 : index
      %162 = vector.load %arg5[%c3_89, %c0_90] : memref<4x256xf32, #tpu.memory_space<vmem>>, vector<1x256xf32>
      %cst_91 = arith.constant dense<0.000000e+00> : vector<1xf32>
      %163 = vector.multi_reduction <add>, %162, %cst_91 [1] : vector<1x256xf32> to vector<1xf32>
      %164 = vector.shape_cast %163 : vector<1xf32> to vector<1x1xf32>
      %c3_92 = arith.constant 3 : index
      %c0_93 = arith.constant 0 : index
      %165 = vector.load %arg6[%c3_92, %c0_93] : memref<4x256xf32, #tpu.memory_space<vmem>>, vector<1x256xf32>
      %cst_94 = arith.constant dense<0.000000e+00> : vector<1xf32>
      %166 = vector.multi_reduction <add>, %165, %cst_94 [1] : vector<1x256xf32> to vector<1xf32>
      %167 = vector.shape_cast %166 : vector<1xf32> to vector<1x1xf32>
      %cst_95 = arith.constant 2.000000e+00 : f32
      %168 = vector.broadcast %cst_95 : f32 to vector<1x1xf32>
      %169 = arith.mulf %168, %164 : vector<1x1xf32>
      %cst_96 = arith.constant 9.99999974E-6 : f32
      %170 = vector.broadcast %cst_96 : f32 to vector<1x1xf32>
      %171 = arith.addf %169, %170 : vector<1x1xf32>
      %cst_97 = arith.constant 9.99999974E-6 : f32
      %172 = vector.broadcast %cst_97 : f32 to vector<1x1xf32>
      %173 = arith.addf %167, %172 : vector<1x1xf32>
      %174 = arith.divf %171, %173 : vector<1x1xf32>
      %cst_98 = arith.constant 1.000000e+00 : f32
      %175 = vector.broadcast %cst_98 : f32 to vector<1x1xf32>
      %176 = arith.subf %175, %174 : vector<1x1xf32>
      %c3_99 = arith.constant 3 : index
      %177 = memref.load %arg3[%c3_99] : memref<4xf32, #tpu.memory_space<smem>>
      %178 = vector.broadcast %177 : f32 to vector<1x1xf32>
      %179 = arith.mulf %176, %178 : vector<1x1xf32>
      %180 = arith.addf %159, %179 : vector<1x1xf32>
      %181 = vector.broadcast %177 : f32 to vector<1x1xf32>
      %182 = arith.addf %161, %181 : vector<1x1xf32>
      %183 = arith.divf %180, %182 : vector<1x1xf32>
      %c0_100 = arith.constant 0 : index
      %c0_101 = arith.constant 0 : index
      %184 = vector.load %arg4[%c0_100, %c0_101] : memref<1x1xf32, #tpu.memory_space<vmem>>, vector<1x1xf32>
      tpu.vector_store %arg4[%c0_100, %c0_101], %183 {strides = array<i32>} : memref<1x1xf32, #tpu.memory_space<vmem>>, vector<1x1xf32>,
    } else {
    }
    return
  }
  func.func @transform_0(%arg0: i32) -> (i32, i32, i32) {
    %c0_i32 = arith.constant 0 : i32
    %c0_i32_0 = arith.constant 0 : i32
    %c0_i32_1 = arith.constant 0 : i32
    return %c0_i32, %c0_i32_0, %arg0 : i32, i32, i32
  }
  func.func @transform_1(%arg0: i32) -> (i32, i32) {
    %c0_i32 = arith.constant 0 : i32
    %c0_i32_0 = arith.constant 0 : i32
    return %c0_i32, %arg0 : i32, i32
  }
  func.func @transform_2(%arg0: i32) -> i32 {
    %c0_i32 = arith.constant 0 : i32
    %c0_i32_0 = arith.constant 0 : i32
    return %c0_i32 : i32
  }
  func.func @transform_3(%arg0: i32) -> (i32, i32) {
    %c0_i32 = arith.constant 0 : i32
    %c0_i32_0 = arith.constant 0 : i32
    %c0_i32_1 = arith.constant 0 : i32
    return %c0_i32, %c0_i32_0 : i32, i32
  }
}

</mosaic_0001>

<bundles_post_ra>
// kernel: tpu_custom_call.1
= control target key start
LH: loop header
LB: loop body
LE: loop exit
PB: predicated region body
PF: predicated region fallthrough
CT: control target
= control target key end

     0   :  { %8 = vsyncpa [#allocation5], 0  ;;  %s1308_s0 = inlined_call_operand.hbm [shape: f32[2,4,256], index: 0, kind: input, shape index: {}]   ;;  %s1309_s1 = inlined_call_operand.hbm [shape: s32[2,256], index: 1, kind: input, shape index: {}]   ;;  %s1310_s2 = inlined_call_operand.vmem [shape: f32[4], index: 2, kind: input, shape index: {}]   ;;  %s1311_s3 = inlined_call_operand.hbm [shape: f32[1,1], index: 3, kind: output, shape index: {}]  }
   0x1   :  { %9 = vsyncpa [#allocation9], 0 }
   0x2   :  { %10 = vsyncpa [#allocation7], 0 }
   0x3   :  { %11 = vsyncpa [#allocation6], 0  ;;  %s1025_s12 = smov [#allocation4]   ;;  %s939_s16 = scalar_lea.hbm %s1308_s0, 256 }
   0x4   :  { %s17_s13 = sshll.u32 %s1025_s12, 4  ;;  %p940_p0 = scmp.ne.s32.totalorder %s1308_s0, %s939_s16  ;;  %s18_s13 = int_to_ptr.vmem [resolvable:$true] %s17_s13 }
   0x5   :  { %p943_p1 = scmp.lt.u32.totalorder %s939_s16, %s1308_s0 }
   0x7   :  { %p945_p2 = pnand %p943_p1, %p940_p0 }
   0x9   :  { %948 = shalt.err (!%p945_p2)
}
   0xa   :  { %s949_s21 = scalar_lea.vmem %s18_s13, 256  ;;  %p954_p4 = scmp.lt.s32.totalorder %s18_s13, %s18_s13 }
   0xb   :  { %p950_p3 = scmp.ne.s32.totalorder %s18_s13, %s949_s21  ;;  %p955_p5 = scmp.lt.s32.totalorder %s949_s21, %s949_s21 }
   0xd   :  { %p956_p6 = por %p955_p5, %p954_p4 }
   0xf   :  { %p957_p7 = pnand %p956_p6, %p950_p3 }
  0x11   :  { %960 = shalt.err (!%p957_p7)
}
  0x12   :  { %s1026_s22 = smov 128   ;;  %s1027_s23 = smov 8  }
  0x13   :  { %23 = dma.hbm_to_vmem [thread:$0]  %s1308_s0, 256, %s18_s13, [#allocation5], %s1026_s22, %s1026_s22, %s1027_s23  }
  0x14   :  { %s1028_s26 = smov [#allocation8]   ;;  %s40_s30 = sshll.u32 %s1310_s2, 4  ;;  %s41_s30 = int_to_ptr.vmem [resolvable:$true] %s40_s30 }
  0x15   :  { %s30_s27 = sshll.u32 %s1028_s26, 4  ;;  %s961_s6 = scalar_lea.hbm %s1309_s1, 64  ;;  %s31_s27 = int_to_ptr.vmem [resolvable:$true] %s30_s27 }
  0x16   :  { %p962_p8 = scmp.ne.s32.totalorder %s1309_s1, %s961_s6  ;;  %p965_p9 = scmp.lt.u32.totalorder %s961_s6, %s1309_s1 }
  0x18   :  { %p967_p10 = pnand %p965_p9, %p962_p8 }
  0x1a   :  { %970 = shalt.err (!%p967_p10)
}
  0x1b   :  { %s971_s0 = scalar_lea.vmem %s31_s27, 64  ;;  %p976_p12 = scmp.lt.s32.totalorder %s31_s27, %s31_s27 }
  0x1c   :  { %p972_p11 = scmp.ne.s32.totalorder %s31_s27, %s971_s0  ;;  %p977_p13 = scmp.lt.s32.totalorder %s971_s0, %s971_s0 }
  0x1e   :  { %p978_p0 = por %p977_p13, %p976_p12 }
  0x20   :  { %p979_p1 = pnand %p978_p0, %p972_p11 }
  0x22   :  { %982 = shalt.err (!%p979_p1)
}
  0x23   :  { %33 = dma.hbm_to_vmem [thread:$0]  %s1309_s1, 64, %s31_s27, [#allocation9]  }
  0x24   :  { %s983_s12 = scalar_lea.vmem %s41_s30, 16  ;;  %p988_p3 = scmp.lt.s32.totalorder %s41_s30, %s41_s30 }
  0x25   :  { %p984_p2 = scmp.ne.s32.totalorder %s41_s30, %s983_s12  ;;  %p989_p4 = scmp.lt.s32.totalorder %s983_s12, %s983_s12 }
  0x27   :  { %p990_p5 = por %p989_p4, %p988_p3 }
  0x29   :  { %p991_p6 = pnand %p990_p5, %p984_p2 }
  0x2b   :  { %994 = shalt.err (!%p991_p6)
}
  0x2c   :  { %s1029_s13 = smov [#allocation10]  }
  0x2d   :  { %43 = dma.vmem_to_smem %s41_s30, 16, %s1029_s13, [#allocation7]  }
  0x2e   :  { %1017 = dma.done.wait [#allocation5], 256  }
  0x2f   :  { %1018 = vsyncadd [#allocation5], 4294967040 }
  0x30   :  { %1019 = dma.done.wait [#allocation9], 64  }
  0x31   :  { %1020 = vsyncadd [#allocation9], 4294967232 }
  0x32   :  { %1021 = dma.done.wait [#allocation7], 16  }
  0x33   :  { %1022 = vsyncadd [#allocation7], 4294967280 }
  0x34   :  { %53 = sfence }
  0x35   :  { %v60_v0 = vld [vmem:[#allocation8] sm:$0xf]  ;;  %v68_v1 = vlaneseq  ;;  %v1030_v2 = vmov 0.0   ;;  %v1031_v3 = vmov 1983009808   ;;  %vm75_vm5 = vcmask 1041408  }
  0x36   :  { %59 = vst [vmem:[#allocation3] sm:$0xff] %v1030_v2  ;;  %vm61_vm0 = vcmp.ne.s32.totalorder %v60_v0, 4294967295  ;;  %v66_v4 = vunpack.c.l.s4 %v1031_v3  ;;  %58 = vst [vmem:[#allocation2] sm:$0xff] %v1030_v2  ;;  %v90_v5 = vld [vmem:[#allocation4] ss:$4 sm:$0x3] }
  0x37   :  { %vm93_vm1 = vcmp.eq.s32.totalorder %v60_v0, 0  ;;  %vm249_vm2 = vcmp.eq.s32.totalorder %v60_v0, 1  ;;  %v1082_v7 = vshrl.u32 %v68_v1, 7  ;;  %v92_v8 = vld [vmem:[#allocation4 + $0x8] ss:$4 sm:$0x3]  ;;  %v150_v18 = vmul.f32 %v90_v5, %v90_v5 }
  0x38   :  { %v67_v6 = vunpack.c.0.s8 %v66_v4  ;;  %v912_v9 = vsel %vm61_vm0, 1.0, %v1030_v2  ;;  %v1032_v10 = vmov 1966171168   ;;  %vm403_vm3 = vcmp.eq.s32.totalorder %v60_v0, 2  ;;  %s1284_s1 = sld [smem:[#allocation10]]  ;;  %s1286_s14 = sld [smem:[#allocation10 + $0x1]] }
  0x39   :  { %v98_v11 = vunpack.c.l.s4 %v1032_v10  ;;  %vm557_vm4 = vcmp.eq.s32.totalorder %v60_v0, 3  ;;  %v1084_v12 = vld [vmem:[#allocation4 + $0x2] ss:$4 sm:$0x3]  ;;  %v913_v14 = vsel %vm93_vm1, 1.0, %v1030_v2  ;;  %v914_v15 = vsel %vm249_vm2, 1.0, %v1030_v2 }
  0x3a   :  { %v70_v13 = vsub.s32 %v67_v6, %v1082_v7  ;;  %v1087_v16 = vld [vmem:[#allocation4 + $0xa] ss:$4 sm:$0x3]  ;;  %v246_v19 = vld [vmem:[#allocation4 + $0x1] ss:$4 sm:$0x3]  ;;  %v151_v26 = vmul.f32 %v92_v8, %v92_v8  ;;  %v460_v27 = vmul.f32 %v1084_v12, %v1084_v12 }
  0x3b   :  { %v99_v17 = vunpack.c.0.s8 %v98_v11  ;;  %v248_v20 = vld [vmem:[#allocation4 + $0x9] ss:$4 sm:$0x3]  ;;  %v915_v22 = vsel %vm403_vm3, 1.0, %v1030_v2  ;;  %v916_v23 = vsel %vm557_vm4, 1.0, %v1030_v2  ;;  %v1090_v24 = vsub.s32 0, %v1082_v7 }
  0x3c   :  { %v71_v21 = vrot.slane %v912_v9, %v70_v13  ;;  %v461_v28 = vmul.f32 %v1087_v16, %v1087_v16  ;;  %v1099_v29 = vld [vmem:[#allocation4 + $0x3] ss:$4 sm:$0x3]  ;;  %v1101_v30 = vld [vmem:[#allocation4 + $0xb] ss:$4 sm:$0x3]  ;;  %v306_v33 = vmul.f32 %v246_v19, %v246_v19  ;;  %v307_v34 = vmul.f32 %v248_v20, %v248_v20 }
  0x3d   :  { %v1093_v25 = vsub.s32 %v99_v17, %v1082_v7  ;;  %v614_v41 = vmul.f32 %v1099_v29, %v1099_v29  ;;  %v615_v42 = vmul.f32 %v1101_v30, %v1101_v30  ;;  %vm1165_vm6 = vcmp.lt.s32.totalorder %v68_v1, 256  ;;  %s1288_s15 = sld [smem:[#allocation10 + $0x2]]  ;;  %s1292_s16 = sld [smem:[#allocation10 + $0x3]] }
  0x3e   :  { %v72_v31 = vcombine.high %v71_v21, %v71_v21  ;;  %v76_v32 = vsel %vm75_vm5, %v71_v21, 0.0  ;;  %vm722_vm7 = vcmask 1040384   ;;  %s1033_s17 = smov [#allocation11]   ;;  %vm893_vm8 = vcmask 0  }
  0x3f   :  { %v77_v35 = vrot.slane %v76_v32, 4  ;;  %v103_v36 = vrot.slane %v913_v14, %v1093_v25  ;;  %v259_v37 = vrot.slane %v914_v15, %v1093_v25  ;;  %v1107_v38 = vrot.slane %v916_v23, %v1093_v25  ;;  %s901_s18 = sshll.u32 %s1033_s17, 4  ;;  %s902_s18 = int_to_ptr.vmem [resolvable:$true] %s901_s18 }
  0x40   :  { %v83_v39 = vsel %vm75_vm5, %v72_v31, 0.0  ;;  %v1111_v40 = vrot.slane %v915_v22, %v1093_v25  ;;  %s995_s19 = scalar_lea.vmem %s902_s18, 16  ;;  %s999_s20 = scalar_lea.vmem %s902_s18, 32 }
  0x41   :  { %v78_v43 = vadd.f32 %v77_v35, %v76_v32  ;;  %v84_v44 = vrot.slane %v83_v39, 4  ;;  %v104_v45 = vcombine.high %v103_v36, %v103_v36  ;;  %v152_v46 = vadd.f32 %v150_v18, %v103_v36  ;;  %p996_p7 = scmp.ne.s32.totalorder %s902_s18, %s995_s19  ;;  %p1000_p8 = scmp.lt.s32.totalorder %s902_s18, %s902_s18 }
  0x42   :  { %v1119_v47 = vcombine.high %v1111_v40, %v1111_v40  ;;  %v462_v48 = vadd.f32 %v460_v27, %v1111_v40  ;;  %v260_v49 = vcombine.high %v259_v37, %v259_v37  ;;  %v308_v50 = vadd.f32 %v306_v33, %v259_v37  ;;  %p1001_p9 = scmp.lt.s32.totalorder %s999_s20, %s995_s19 }
  0x43   :  { %v79_v51 = vrot.slane %v78_v43, 2  ;;  %v85_v52 = vadd.f32 %v84_v44, %v83_v39  ;;  %v153_v53 = vadd.f32 %v151_v26, %v104_v45  ;;  %v1124_v54 = vcombine.high %v1107_v38, %v1107_v38 }
  0x44   :  { %v463_v55 = vadd.f32 %v461_v28, %v1119_v47  ;;  %v309_v56 = vadd.f32 %v307_v34, %v260_v49  ;;  %v616_v57 = vadd.f32 %v614_v41, %v1107_v38  ;;  %v1128_v58 = vmul.f32 %v103_v36, %v90_v5  ;;  %p1002_p10 = por %p1001_p9, %p1000_p8 }
  0x45   :  { %v80_v59 = vadd.f32 %v79_v51, %v78_v43  ;;  %v86_v60 = vrot.slane %v85_v52, 2  ;;  %v156_v61 = vcombine.low %v152_v46, %v153_v53  ;;  %v617_v62 = vadd.f32 %v615_v42, %v1124_v54 }
  0x46   :  { %v466_v63 = vcombine.low %v462_v48, %v463_v55  ;;  %v312_v0 = vcombine.low %v308_v50, %v309_v56  ;;  %v1131_v2 = vmul.f32 %v104_v45, %v92_v8  ;;  %v1133_v3 = vmul.f32 %v259_v37, %v246_v19  ;;  %p1003_p11 = pnand %p1002_p10, %p996_p7 }
  0x47   :  { %v81_v4 = vrot.slane %v80_v59, 1  ;;  %v87_v6 = vadd.f32 %v86_v60, %v85_v52  ;;  %v163_v9 = vrot.slane %v156_v61, %v1093_v25  ;;  %v620_v10 = vcombine.low %v616_v57, %v617_v62 }
  0x48   :  { %v473_v11 = vrot.slane %v466_v63, %v1093_v25  ;;  %v319_v5 = vrot.slane %v312_v0, %v1093_v25  ;;  %v111_v13 = vcombine.low %v1128_v58, %v1131_v2  ;;  %v1140_v14 = vmul.f32 %v260_v49, %v248_v20 }
  0x49   :  { %v1142_v15 = vadd.f32 %v81_v4, %v80_v59  ;;  %v88_v8 = vrot.slane %v87_v6, 1  ;;  %v164_v17 = vcombine.high %v163_v9, %v163_v9  ;;  %v171_v18 = vrot.slane %v163_v9, %v1093_v25 }
  0x4a   :  { %v474_v19 = vcombine.high %v473_v11, %v473_v11  ;;  %v481_v21 = vrot.slane %v473_v11, %v1093_v25  ;;  %v320_v22 = vcombine.high %v319_v5, %v319_v5  ;;  %v327_v23 = vrot.slane %v319_v5, %v1093_v25 }
  0x4b   :  { %v1147_v26 = vadd.f32 %v88_v8, %v87_v6  ;;  %v178_v27 = vrot.slane %v164_v17, %v1093_v25  ;;  %v181_v28 = vsel %vm75_vm5, %v171_v18, 0.0  ;;  %v627_v20 = vrot.slane %v620_v10, %v1093_v25 }
  0x4c   :  { %v182_v31 = vrot.slane %v181_v28, 4  ;;  %v488_v32 = vrot.slane %v474_v19, %v1093_v25  ;;  %v491_v33 = vsel %vm75_vm5, %v481_v21, 0.0  ;;  %v334_v34 = vrot.slane %v320_v22, %v1093_v25 }
  0x4d   :  { %v188_v35 = vsel %vm75_vm5, %v178_v27, 0.0  ;;  %v492_v36 = vrot.slane %v491_v33, 4  ;;  %v337_v37 = vsel %vm75_vm5, %v327_v23, 0.0  ;;  %v628_v39 = vcombine.high %v627_v20, %v627_v20 }
  0x4e   :  { %v183_v41 = vadd.f32 %v182_v31, %v181_v28  ;;  %v189_v42 = vrot.slane %v188_v35, 4  ;;  %v498_v43 = vsel %vm75_vm5, %v488_v32, 0.0  ;;  %v338_v44 = vrot.slane %v337_v37, 4 }
  0x4f   :  { %v493_v45 = vadd.f32 %v492_v36, %v491_v33  ;;  %v499_v46 = vrot.slane %v498_v43, 4  ;;  %v344_v48 = vsel %vm75_vm5, %v334_v34, 0.0  ;;  %v635_v49 = vrot.slane %v627_v20, %v1093_v25 }
  0x50   :  { %v184_v50 = vrot.slane %v183_v41, 2  ;;  %v190_v51 = vadd.f32 %v189_v42, %v188_v35  ;;  %v339_v52 = vadd.f32 %v338_v44, %v337_v37  ;;  %v345_v53 = vrot.slane %v344_v48, 4 }
  0x51   :  { %v494_v55 = vrot.slane %v493_v45, 2  ;;  %v500_v56 = vadd.f32 %v499_v46, %v498_v43  ;;  %v642_v57 = vrot.slane %v628_v39, %v1093_v25  ;;  %v645_v59 = vsel %vm75_vm5, %v635_v49, 0.0 }
  0x52   :  { %v185_v60 = vadd.f32 %v184_v50, %v183_v41  ;;  %v191_v61 = vrot.slane %v190_v51, 2  ;;  %v340_v62 = vrot.slane %v339_v52, 2  ;;  %v346_v63 = vadd.f32 %v345_v53, %v344_v48 }
  0x53   :  { %v495_v0 = vadd.f32 %v494_v55, %v493_v45  ;;  %v501_v4 = vrot.slane %v500_v56, 2  ;;  %v646_v6 = vrot.slane %v645_v59, 4  ;;  %v652_v9 = vsel %vm75_vm5, %v642_v57, 0.0 }
  0x54   :  { %v186_v10 = vrot.slane %v185_v60, 1  ;;  %v192_v11 = vadd.f32 %v191_v61, %v190_v51  ;;  %v341_v5 = vadd.f32 %v340_v62, %v339_v52  ;;  %v347_v8 = vrot.slane %v346_v63, 2 }
  0x55   :  { %v496_v17 = vrot.slane %v495_v0, 1  ;;  %v502_v18 = vadd.f32 %v501_v4, %v500_v56  ;;  %v647_v19 = vadd.f32 %v646_v6, %v645_v59  ;;  %v653_v21 = vrot.slane %v652_v9, 4 }
  0x56   :  { %v187_v22 = vadd.f32 %v186_v10, %v185_v60  ;;  %v193_v23 = vrot.slane %v192_v11, 1  ;;  %v342_v27 = vrot.slane %v341_v5, 1  ;;  %v348_v28 = vadd.f32 %v347_v8, %v346_v63  ;;  %v530_v10 = vld [vmem:[#allocation3 + $0x2] ss:$4 sm:$0x3] }
  0x57   :  { %v497_v20 = vadd.f32 %v496_v17, %v495_v0  ;;  %v503_v31 = vrot.slane %v502_v18, 1  ;;  %v648_v32 = vrot.slane %v647_v19, 2  ;;  %v654_v33 = vadd.f32 %v653_v21, %v652_v9  ;;  %v222_v0 = vld [vmem:[#allocation3] ss:$4 sm:$0x3] }
  0x58   :  { %v194_v34 = vadd.f32 %v193_v23, %v192_v11  ;;  %v223_v35 = vmul.f32 %v187_v22, %v1142_v15  ;;  %v343_v36 = vadd.f32 %v342_v27, %v341_v5  ;;  %v349_v37 = vrot.slane %v348_v28, 1 }
  0x59   :  { %v504_v41 = vadd.f32 %v503_v31, %v502_v18  ;;  %v531_v42 = vmul.f32 %v497_v20, %v1142_v15  ;;  %v649_v43 = vadd.f32 %v648_v32, %v647_v19  ;;  %v655_v44 = vrot.slane %v654_v33, 2  ;;  %v376_v18 = vld [vmem:[#allocation3 + $0x1] ss:$4 sm:$0x3] }
  0x5a   :  { %v224_v45 = vmul.f32 %v194_v34, %v1147_v26  ;;  %v350_v46 = vadd.f32 %v349_v37, %v348_v28  ;;  %v377_v48 = vmul.f32 %v343_v36, %v1142_v15  ;;  %v118_v49 = vrot.slane %v111_v13, %v1093_v25 }
  0x5b   :  { %v532_v1 = vmul.f32 %v504_v41, %v1147_v26  ;;  %v650_v50 = vrot.slane %v649_v43, 1  ;;  %v656_v51 = vadd.f32 %v655_v44, %v654_v33  ;;  %v267_v52 = vcombine.low %v1133_v3, %v1140_v14 }
  0x5c   :  { %v227_v53 = vcombine.low %v223_v35, %v224_v45  ;;  %v378_v55 = vmul.f32 %v350_v46, %v1147_v26  ;;  %v119_v56 = vcombine.high %v118_v49, %v118_v49  ;;  %v126_v57 = vrot.slane %v118_v49, %v1093_v25  ;;  %v684_v46 = vld [vmem:[#allocation3 + $0x3] ss:$4 sm:$0x3] }
  0x5d   :  { %v535_v59 = vcombine.low %v531_v42, %v532_v1  ;;  %v651_v60 = vadd.f32 %v650_v50, %v649_v43  ;;  %v657_v61 = vrot.slane %v656_v51, 1  ;;  %v274_v62 = vrot.slane %v267_v52, %v1093_v25 }
  0x5e   :  { %v234_v58 = vrot.slane %v227_v53, %v1093_v25  ;;  %v381_v2 = vcombine.low %v377_v48, %v378_v55  ;;  %v133_v13 = vrot.slane %v119_v56, %v1093_v25  ;;  %v136_v63 = vsel %vm75_vm5, %v126_v57, 0.0 }
  0x5f   :  { %v542_v3 = vrot.slane %v535_v59, %v1093_v25  ;;  %v658_v14 = vadd.f32 %v657_v61, %v656_v51  ;;  %v685_v4 = vmul.f32 %v651_v60, %v1142_v15  ;;  %v137_v6 = vrot.slane %v136_v63, 4 }
  0x60   :  { %v241_v9 = vrot.slane %v234_v58, %v1093_v25  ;;  %v388_v11 = vrot.slane %v381_v2, %v1093_v25  ;;  %v143_v5 = vsel %vm75_vm5, %v133_v13, 0.0  ;;  %v275_v8 = vcombine.high %v274_v62, %v274_v62 }
  0x61   :  { %v549_v17 = vrot.slane %v542_v3, %v1093_v25  ;;  %v686_v19 = vmul.f32 %v658_v14, %v1147_v26  ;;  %v138_v21 = vadd.f32 %v137_v6, %v136_v63  ;;  %v144_v22 = vrot.slane %v143_v5, 4 }
  0x62   :  { %v243_v23 = vadd.f32 %v241_v9, %v222_v0  ;;  %v395_v27 = vrot.slane %v388_v11, %v1093_v25  ;;  %v282_v28 = vrot.slane %v274_v62, %v1093_v25  ;;  %v289_v20 = vrot.slane %v275_v8, %v1093_v25 }
  0x63   :  { %v551_v31 = vadd.f32 %v549_v17, %v530_v10  ;;  %v689_v32 = vcombine.low %v685_v4, %v686_v19  ;;  %v139_v33 = vrot.slane %v138_v21, 2  ;;  %v145_v34 = vadd.f32 %v144_v22, %v143_v5 }
  0x64   :  { %244 = vst.msk [vmem:[#allocation3] ss:$4 sm:$0x3] %vm1165_vm6, %v243_v23  ;;  %v397_v35 = vadd.f32 %v395_v27, %v376_v18  ;;  %v292_v36 = vsel %vm75_vm5, %v282_v28, 0.0  ;;  %v299_v37 = vsel %vm75_vm5, %v289_v20, 0.0  ;;  %v417_v41 = vmul.f32 %v1111_v40, %v1084_v12 }
  0x65   :  { %552 = vst.msk [vmem:[#allocation3 + $0x2] ss:$4 sm:$0x3] %vm1165_vm6, %v551_v31  ;;  %v696_v42 = vrot.slane %v689_v32, %v1093_v25  ;;  %v140_v43 = vadd.f32 %v139_v33, %v138_v21  ;;  %v146_v44 = vrot.slane %v145_v34, 2  ;;  %v293_v45 = vrot.slane %v292_v36, 4 }
  0x66   :  { %398 = vst.msk [vmem:[#allocation3 + $0x1] ss:$4 sm:$0x3] %vm1165_vm6, %v397_v35  ;;  %v300_v48 = vrot.slane %v299_v37, 4  ;;  %v418_v49 = vmul.f32 %v1119_v47, %v1087_v16  ;;  %v571_v1 = vmul.f32 %v1107_v38, %v1099_v29  ;;  %v572_v12 = vmul.f32 %v1124_v54, %v1101_v30 }
  0x67   :  { %v703_v40 = vrot.slane %v696_v42, %v1093_v25  ;;  %v141_v50 = vrot.slane %v140_v43, 1  ;;  %v147_v51 = vadd.f32 %v146_v44, %v145_v34  ;;  %v294_v52 = vadd.f32 %v293_v45, %v292_v36  ;;  %v195_v35 = vld [vmem:[#allocation2] ss:$4 sm:$0x3] }
  0x68   :  { %v1214_v53 = vsub.s32 1, %v1082_v7  ;;  %v301_v55 = vadd.f32 %v300_v48, %v299_v37  ;;  %v421_v56 = vcombine.low %v417_v41, %v418_v49  ;;  %v575_v57 = vcombine.low %v571_v1, %v572_v12 }
  0x69   :  { %v705_v59 = vadd.f32 %v703_v40, %v684_v46  ;;  %v142_v60 = vadd.f32 %v141_v50, %v140_v43  ;;  %v148_v16 = vrot.slane %v147_v51, 1  ;;  %v295_v47 = vrot.slane %v294_v52, 2 }
  0x6a   :  { %v302_v29 = vrot.slane %v301_v55, 2  ;;  %v428_v38 = vrot.slane %v421_v56, %v1093_v25  ;;  %v582_v62 = vrot.slane %v575_v57, %v1093_v25 }
  0x6b   :  { %v728_v30 = vld [vmem:[#allocation3] ss:$4 sm:$0x3]  ;;  %706 = vst.msk [vmem:[#allocation3 + $0x3] ss:$4 sm:$0x3] %vm1165_vm6, %v705_v59  ;;  %v149_v54 = vadd.f32 %v148_v16, %v147_v51  ;;  %v196_v61 = vmul.f32 %v142_v60, %v1142_v15  ;;  %v296_v7 = vadd.f32 %v295_v47, %v294_v52 }
  0x6c   :  { %v733_v58 = vrot.slane %v728_v30, %v1090_v24  ;;  %v737_v2 = vrot.slane %v728_v30, %v1214_v53  ;;  %v818_v13 = vld [vmem:[#allocation3 + $0x2] ss:$4 sm:$0x3]  ;;  %v303_v63 = vadd.f32 %v302_v29, %v301_v55  ;;  %v429_v0 = vcombine.high %v428_v38, %v428_v38 }
  0x6d   :  { %v823_v3 = vrot.slane %v818_v13, %v1090_v24  ;;  %v827_v14 = vrot.slane %v818_v13, %v1214_v53  ;;  %v773_v4 = vld [vmem:[#allocation3 + $0x1] ss:$4 sm:$0x3]  ;;  %v197_v6 = vmul.f32 %v149_v54, %v1147_v26  ;;  %v297_v9 = vrot.slane %v296_v7, 1 }
  0x6e   :  { %v740_v10 = vsel %vm722_vm7, %v733_v58, 0.0  ;;  %v741_v11 = vsel %vm722_vm7, %v737_v2, 0.0  ;;  %v778_v5 = vrot.slane %v773_v4, %v1090_v24  ;;  %v782_v8 = vrot.slane %v773_v4, %v1214_v53 }
  0x6f   :  { %v742_v17 = vadd.f32 %v741_v11, %v740_v10  ;;  %v830_v18 = vsel %vm722_vm7, %v823_v3, 0.0  ;;  %v831_v19 = vsel %vm722_vm7, %v827_v14, 0.0  ;;  %v200_v21 = vcombine.low %v196_v61, %v197_v6  ;;  %v352_v61 = vld [vmem:[#allocation2 + $0x1] ss:$4 sm:$0x3] }
  0x70   :  { %v832_v22 = vadd.f32 %v831_v19, %v830_v18  ;;  %v785_v23 = vsel %vm722_vm7, %v778_v5, 0.0  ;;  %v786_v27 = vsel %vm722_vm7, %v782_v8, 0.0  ;;  %v298_v28 = vadd.f32 %v297_v9, %v296_v7 }
  0x71   :  { %743 = vadd.xlane.f32.xlu0 %v742_v17  ;;  %v787_v20 = vadd.f32 %v786_v27, %v785_v23  ;;  %v207_v31 = vrot.slane %v200_v21, %v1093_v25  ;;  %v304_v32 = vrot.slane %v303_v63, 1  ;;  %v436_v33 = vrot.slane %v428_v38, %v1093_v25 }
  0x72   :  { %833 = vadd.xlane.f32.xlu1 %v832_v22  ;;  %v863_v34 = vld [vmem:[#allocation3 + $0x3] ss:$4 sm:$0x3]  ;;  %v353_v36 = vmul.f32 %v298_v28, %v1142_v15  ;;  %v443_v37 = vrot.slane %v429_v0, %v1093_v25  ;;  %v583_v41 = vcombine.high %v582_v62, %v582_v62  ;;  %v590_v42 = vrot.slane %v582_v62, %v1093_v25 }
  0x73   :  { %v868_v43 = vrot.slane %v863_v34, %v1090_v24  ;;  %v872_v44 = vrot.slane %v863_v34, %v1214_v53  ;;  %v214_v45 = vrot.slane %v207_v31, %v1093_v25  ;;  %v305_v46 = vadd.f32 %v304_v32, %v303_v63 }
  0x74   :  { %v446_v48 = vsel %vm75_vm5, %v436_v33, 0.0  ;;  %v453_v49 = vsel %vm75_vm5, %v443_v37, 0.0  ;;  %v597_v1 = vrot.slane %v583_v41, %v1093_v25  ;;  %v600_v12 = vsel %vm75_vm5, %v590_v42, 0.0 }
  0x75   :  { %788 = vadd.xlane.f32.xlu0 %v787_v20  ;;  %v875_v40 = vsel %vm722_vm7, %v868_v43, 0.0  ;;  %v876_v50 = vsel %vm722_vm7, %v872_v44, 0.0  ;;  %v216_v51 = vadd.f32 %v214_v45, %v195_v35  ;;  %v354_v52 = vmul.f32 %v305_v46, %v1147_v26  ;;  %v506_v44 = vld [vmem:[#allocation2 + $0x2] ss:$4 sm:$0x3] }
  0x76   :  { %v877_v55 = vadd.f32 %v876_v50, %v875_v40  ;;  %v447_v56 = vrot.slane %v446_v48, 4  ;;  %v454_v57 = vrot.slane %v453_v49, 4  ;;  %v601_v59 = vrot.slane %v600_v12, 4 }
  0x77   :  { %221 = vst.msk [vmem:[#allocation2] ss:$4 sm:$0x3] %vm1165_vm6, %v216_v51  ;;  %v357_v60 = vcombine.low %v353_v36, %v354_v52  ;;  %v607_v16 = vsel %vm75_vm5, %v597_v1, 0.0 }
  0x78   :  { %878 = vadd.xlane.f32.xlu1 %v877_v55  ;;  %v448_v47 = vadd.f32 %v447_v56, %v446_v48  ;;  %v455_v29 = vadd.f32 %v454_v57, %v453_v49  ;;  %v602_v38 = vadd.f32 %v601_v59, %v600_v12  ;;  %v608_v30 = vrot.slane %v607_v16, 4  ;;  %v660_v49 = vld [vmem:[#allocation2 + $0x3] ss:$4 sm:$0x3] }
  0x79   :  { %v364_v54 = vrot.slane %v357_v60, %v1093_v25 }
  0x7a   :  { %v449_v7 = vrot.slane %v448_v47, 2  ;;  %v456_v62 = vrot.slane %v455_v29, 2  ;;  %v603_v58 = vrot.slane %v602_v38, 2  ;;  %v609_v2 = vadd.f32 %v608_v30, %v607_v16 }
  0x7b   :  { %v371_v13 = vrot.slane %v364_v54, %v1093_v25 }
  0x7c   :  { %v450_v63 = vadd.f32 %v449_v7, %v448_v47  ;;  %v457_v0 = vadd.f32 %v456_v62, %v455_v29  ;;  %v604_v3 = vadd.f32 %v603_v58, %v602_v38  ;;  %v610_v14 = vrot.slane %v609_v2, 2 }
  0x7d   :  { %v373_v4 = vadd.f32 %v371_v13, %v352_v61  ;;  %v752_v7 = vstv %s1284_s1  ;;  %v797_v62 = vstv %s1286_s14 }
  0x7e   :  { %v710_v6 = vld [vmem:[#allocation2] ss:$4 sm:$0x3]  ;;  %v451_v9 = vrot.slane %v450_v63, 1  ;;  %v458_v10 = vrot.slane %v457_v0, 1  ;;  %v605_v11 = vrot.slane %v604_v3, 1  ;;  %v611_v5 = vadd.f32 %v610_v14, %v609_v2 }
  0x7f   :  { %v715_v8 = vrot.slane %v710_v6, %v1090_v24  ;;  %v719_v17 = vrot.slane %v710_v6, %v1214_v53  ;;  %374 = vst.msk [vmem:[#allocation2 + $0x1] ss:$4 sm:$0x3] %vm1165_vm6, %v373_v4  ;;  %v842_v4 = vstv %s1288_s15 }
  0x80   :  { %v452_v18 = vadd.f32 %v451_v9, %v450_v63  ;;  %v459_v19 = vadd.f32 %v458_v10, %v457_v0  ;;  %v606_v21 = vadd.f32 %v605_v11, %v604_v3  ;;  %v612_v22 = vrot.slane %v611_v5, 1 }
  0x81   :  { %v723_v23 = vsel %vm722_vm7, %v715_v8, 0.0  ;;  %v724_v27 = vsel %vm722_vm7, %v719_v17, 0.0  ;;  %v800_v3 = vadd.f32 %v797_v62, %v752_v7  ;;  %v887_v8 = vstv %s1292_s16 }
  0x82   :  { %v725_v28 = vadd.f32 %v724_v27, %v723_v23  ;;  %v507_v20 = vmul.f32 %v452_v18, %v1142_v15  ;;  %v508_v31 = vmul.f32 %v459_v19, %v1147_v26  ;;  %v613_v32 = vadd.f32 %v612_v22, %v611_v5 }
  0x83   :  { %v661_v33 = vmul.f32 %v606_v21, %v1142_v15  ;;  %v845_v11 = vadd.f32 %v842_v4, %v800_v3 }
  0x84   :  { %726 = vadd.xlane.f32.xlu0 %v725_v28  ;;  %v511_v34 = vcombine.low %v507_v20, %v508_v31  ;;  %v662_v35 = vmul.f32 %v613_v32, %v1147_v26 }
  0x85   :  { %v890_v18 = vadd.f32 %v887_v8, %v845_v11 }
  0x86   :  { %v756_v36 = vld [vmem:[#allocation2 + $0x1] ss:$4 sm:$0x3]  ;;  %v518_v37 = vrot.slane %v511_v34, %v1093_v25  ;;  %v665_v41 = vcombine.low %v661_v33, %v662_v35 }
  0x87   :  { %v761_v42 = vrot.slane %v756_v36, %v1090_v24  ;;  %v765_v43 = vrot.slane %v756_v36, %v1214_v53 }
  0x88   :  { %v525_v45 = vrot.slane %v518_v37, %v1093_v25  ;;  %v672_v46 = vrot.slane %v665_v41, %v1093_v25 }
  0x89   :  { %v768_v48 = vsel %vm722_vm7, %v761_v42, 0.0  ;;  %v769_v15 = vsel %vm722_vm7, %v765_v43, 0.0 }
  0x8a   :  { %v770_v1 = vadd.f32 %v769_v15, %v768_v48  ;;  %v527_v26 = vadd.f32 %v525_v45, %v506_v44  ;;  %v679_v12 = vrot.slane %v672_v46, %v1093_v25 }
  0x8c   :  { %771 = vadd.xlane.f32.xlu1 %v770_v1  ;;  %528 = vst.msk [vmem:[#allocation2 + $0x2] ss:$4 sm:$0x3] %vm1165_vm6, %v527_v26  ;;  %v681_v40 = vadd.f32 %v679_v12, %v660_v49 }
  0x8e   :  { %682 = vst.msk [vmem:[#allocation2 + $0x3] ss:$4 sm:$0x3] %vm1165_vm6, %v681_v40 }
  0x93   :  { %v801_v50 = vld [vmem:[#allocation2 + $0x2] ss:$4 sm:$0x3] }
  0x94   :  { %v806_v51 = vrot.slane %v801_v50, %v1090_v24  ;;  %v810_v52 = vrot.slane %v801_v50, %v1214_v53 }
  0x95   :  { %v846_v55 = vld [vmem:[#allocation2 + $0x3] ss:$4 sm:$0x3] }
  0x96   :  { %v813_v56 = vsel %vm722_vm7, %v806_v51, 0.0  ;;  %v814_v57 = vsel %vm722_vm7, %v810_v52, 0.0  ;;  %v851_v25 = vrot.slane %v846_v55, %v1090_v24  ;;  %v855_v59 = vrot.slane %v846_v55, %v1214_v53 }
  0x97   :  { %v815_v60 = vadd.f32 %v814_v57, %v813_v56 }
  0x98   :  { %v858_v16 = vsel %vm722_vm7, %v851_v25, 0.0  ;;  %v859_v39 = vsel %vm722_vm7, %v855_v59, 0.0 }
  0x99   :  { %816 = vadd.xlane.f32.xlu0 %v815_v60  ;;  %v860_v47 = vadd.f32 %v859_v39, %v858_v16 }
  0x9b   :  { %861 = vadd.xlane.f32.xlu1 %v860_v47 }
  0xfe   :  { %v744_v29 = vpop.xlane.xlu0 %743 }
  0xff   :  { %v834_v38 = vpop.xlane.xlu1 %833  ;;  %v747_v24 = vadd.f32 1e-05, %v744_v29 }
 0x100   :  { %v837_v2 = vadd.f32 1e-05, %v834_v38 }
 0x102   :  { %v789_v30 = vpop.xlane.xlu0 %788 }
 0x103   :  { %v792_v54 = vadd.f32 1e-05, %v789_v30 }
 0x105   :  { %v879_v53 = vpop.xlane.xlu1 %878  ;;  %929 = vrcp.f32 %v792_v54 }
 0x106   :  { %931 = vrcp.f32 %v747_v24  ;;  %v882_v0 = vadd.f32 1e-05, %v879_v53 }
 0x107   :  { %933 = vrcp.f32 %v837_v2 }
 0x108   :  { %935 = vrcp.f32 %v882_v0 }
 0x109   :  { %937 = vrcp.f32 %v890_v18 }
 0x10f   :  { %v930_v6 = vpop.eup %929 }
 0x110   :  { %v932_v10 = vpop.eup %931 }
 0x111   :  { %v727_v61 = vpop.xlane.xlu0 %726  ;;  %v934_v27 = vpop.eup %933 }
 0x112   :  { %v745_v63 = vmul.f32 2.0, %v727_v61  ;;  %v936_v33 = vpop.eup %935 }
 0x113   :  { %v938_v48 = vpop.eup %937 }
 0x114   :  { %v746_v9 = vadd.f32 1e-05, %v745_v63 }
 0x116   :  { %v749_v17 = vmul.f32 %v932_v10, %v746_v9 }
 0x118   :  { %v750_v22 = vsub.f32 1.0, %v749_v17 }
 0x119   :  { %v772_v58 = vpop.xlane.xlu1 %771 }
 0x11a   :  { %v790_v13 = vmul.f32 2.0, %v772_v58  ;;  %v753_v34 = vmul.f32 %v752_v7, %v750_v22 }
 0x11c   :  { %v791_v14 = vadd.f32 1e-05, %v790_v13 }
 0x11e   :  { %v794_v5 = vmul.f32 %v930_v6, %v791_v14 }
 0x120   :  { %v795_v19 = vsub.f32 1.0, %v794_v5 }
 0x122   :  { %v798_v20 = vmul.f32 %v797_v62, %v795_v19 }
 0x124   :  { %v799_v37 = vadd.f32 %v798_v20, %v753_v34 }
 0x126   :  { %v817_v21 = vpop.xlane.xlu0 %816 }
 0x127   :  { %v835_v23 = vmul.f32 2.0, %v817_v21 }
 0x128   :  { %v862_v28 = vpop.xlane.xlu1 %861 }
 0x129   :  { %v836_v31 = vadd.f32 1e-05, %v835_v23  ;;  %v880_v32 = vmul.f32 2.0, %v862_v28 }
 0x12b   :  { %v839_v35 = vmul.f32 %v934_v27, %v836_v31  ;;  %v881_v36 = vadd.f32 1e-05, %v880_v32 }
 0x12d   :  { %v840_v41 = vsub.f32 1.0, %v839_v35  ;;  %v884_v42 = vmul.f32 %v936_v33, %v881_v36 }
 0x12f   :  { %v843_v43 = vmul.f32 %v842_v4, %v840_v41  ;;  %v885_v44 = vsub.f32 1.0, %v884_v42 }
 0x131   :  { %v888_v45 = vmul.f32 %v887_v8, %v885_v44  ;;  %v844_v46 = vadd.f32 %v843_v43, %v799_v37 }
 0x133   :  { %v889_v15 = vadd.f32 %v888_v45, %v844_v46 }
 0x135   :  { %v892_v49 = vmul.f32 %v938_v48, %v889_v15 }
 0x137   :  { %894 = vst.msk [vmem:[#allocation11] sm:$0x1] %vm893_vm8, %v892_v49 }
 0x138   :  { %1006 = shalt.err (!%p1003_p11)
}
 0x139   :  { %s1007_s23 = scalar_lea.hbm %s1311_s3, 16 }
 0x13a   :  { %p1008_p12 = scmp.ne.s32.totalorder %s1311_s3, %s1007_s23  ;;  %p1011_p13 = scmp.lt.u32.totalorder %s1007_s23, %s1311_s3 }
 0x13c   :  { %p1013_p0 = pnand %p1011_p13, %p1008_p12 }
 0x13e   :  { %1016 = shalt.err (!%p1013_p0)
}
 0x13f   :  { %904 = dma.vmem_to_hbm [thread:$0]  %s902_s18, 16, %s1311_s3, [#allocation6]  }
 0x140   :  { %1023 = dma.done.wait [#allocation6], 16  }
 0x141   :  { %1024 = vsyncadd [#allocation6], 4294967280 }
 0x142   :  { %908 = vsyncpa [#allocation5], 1 }
 0x143   :  { %909 = vsyncpa [#allocation9], 1 }
 0x144   :  { %910 = vsyncpa [#allocation6], 1 }
 0x145   :  { %911 = vsyncpa [#allocation7], 1 }

</bundles_post_ra>
